<compile_context>
chip_gen: v6e
topology: v6e:2x2x1
jax: 0.10.0
libtpu: 0.0.40
codegen_flags: <defaults>
</compile_context>

<pallas_src>
import functools

import jax
import jax.numpy as jnp
from jax.experimental import pallas as pl
from jax.experimental.pallas import tpu as pltpu


def se_kernel(x_ref, w1_ref, w2_ref, o_ref, *, inv_hw):
    # x_ref:  (Bt, C, HW_pad)  block of batch elements; HW_pad is 128-aligned,
    #                          zero-padded beyond the true HW.
    # w1_ref: (C, Cr)          fc1 weight, transposed (in -> hidden)
    # w2_ref: (Cr, C)          fc2 weight, transposed (hidden -> out)

    # Squeeze: global average pool over the spatial (lane) dim. Accumulate in
    # f32 without materializing an f32 copy of the whole x block.
    y = jnp.sum(x_ref[...], axis=-1, dtype=jnp.float32) * inv_hw        # (Bt, C)

    # Excitation: Linear -> ReLU -> Linear -> Sigmoid.
    h = jnp.dot(y, w1_ref[...], preferred_element_type=jnp.float32)     # (Bt, Cr)
    h = jnp.maximum(h, 0.0)
    s = jnp.dot(h, w2_ref[...], preferred_element_type=jnp.float32)     # (Bt, C)
    s = jax.nn.sigmoid(s)

    # Channel-wise scale straight from x_ref in its native dtype; only the
    # tiny (Bt, C) gain tensor is cast.
    o_ref[...] = x_ref[...] * s.astype(o_ref.dtype)[:, :, None]


def _pick_batch_tile(B, C, HW_pad, itemsize, block_budget_bytes):
    """Largest divisor Bt of B whose double-buffered in+out footprint
    (4 * Bt * C * HW_pad * itemsize) fits the budget, preferring a grid
    length >= 2 so the batch axis can shard across both v7x TensorCores."""
    divisors = [d for d in range(1, B + 1) if B % d == 0]
    fits = [d for d in divisors
            if 4 * d * C * HW_pad * itemsize <= block_budget_bytes]
    if not fits:
        return 1
    multi = [d for d in fits if B // d >= 2]
    return max(multi) if multi else max(fits)


def se_layer(x_nchw, w1, w2):
    """x_nchw: (B, C, H, W); w1: (Cr, C) fc1 weight; w2: (C, Cr) fc2 weight."""
    B, C, H, W = x_nchw.shape
    HW = H * W
    HW_pad = ((HW + 127) // 128) * 128          # lane-dense last dim
    Cr = w1.shape[0]

    x = x_nchw.reshape(B, C, HW)
    if HW_pad != HW:
        x = jnp.pad(x, ((0, 0), (0, 0), (0, HW_pad - HW)))

    w1_t = w1.T  # (C, Cr)
    w2_t = w2.T  # (Cr, C)

    itemsize = jnp.dtype(x.dtype).itemsize
    # ~28 MiB for the four double-buffered x blocks (2 in + 2 out): safe
    # against v7x's 64 MiB physical VMEM (and trivially v5e/v6e's 128 MiB).
    Bt = _pick_batch_tile(B, C, HW_pad, itemsize, 28 * 1024 * 1024)
    grid = (B // Bt,)

    kernel = functools.partial(se_kernel, inv_hw=1.0 / HW)

    out = pl.pallas_call(
        kernel,
        out_shape=jax.ShapeDtypeStruct((B, C, HW_pad), x.dtype),
        grid_spec=pltpu.PrefetchScalarGridSpec(
            num_scalar_prefetch=0,
            grid=grid,
            in_specs=[
                # If profiling shows exposed DMA at large blocks, add
                # pipeline_mode=pl.Buffered(3) here for a 3-deep input pipe.
                pl.BlockSpec((Bt, C, HW_pad), lambda b: (b, 0, 0)),
                # Weights: constant block index -> DMA'd once, stay resident.
                pl.BlockSpec((C, Cr), lambda b: (0, 0)),
                pl.BlockSpec((Cr, C), lambda b: (0, 0)),
            ],
            out_specs=pl.BlockSpec((Bt, C, HW_pad), lambda b: (b, 0, 0)),
        ),
        compiler_params=pltpu.CompilerParams(
            dimension_semantics=("parallel",),
            vmem_limit_bytes=48 * 1024 * 1024,
        ),
    )(x, w1_t, w2_t)

    if HW_pad != HW:
        out = out[:, :, :HW]
    return out.reshape(B, C, H, W)


def se_layer_ref(x, w1, w2):
    """Pure-JAX reference matching the PyTorch module."""
    y = jnp.mean(x, axis=(2, 3))                 # (B, C)
    h = jnp.maximum(y @ w1.T, 0.0)               # (B, Cr)
    s = jax.nn.sigmoid(h @ w2.T)                 # (B, C)
    return x * s[:, :, None, None]


if __name__ == "__main__":
    B, C, H, W = 2, 16, 16, 16
    reduction = 8
    Cr = C // reduction

    key = jax.random.PRNGKey(0)
    kx, k1, k2 = jax.random.split(key, 3)
    x = jax.random.normal(kx, (B, C, H, W), dtype=jnp.float32)
    # PyTorch Linear weight shape = (out_features, in_features).
    w1 = jax.random.normal(k1, (Cr, C), dtype=jnp.float32) * 0.1   # fc1
    w2 = jax.random.normal(k2, (C, Cr), dtype=jnp.float32) * 0.1   # fc2

    out = se_layer(x, w1, w2)
    out = jax.block_until_ready(out)
    ref = se_layer_ref(x, w1, w2)
    assert out.shape == (B, C, H, W)
    assert jnp.allclose(out, ref, atol=1e-5, rtol=1e-5), "mismatch vs reference"

    # Exercise the lane-padding path (HW = 49, not a multiple of 128).
    x2 = jax.random.normal(kx, (B, C, 7, 7), dtype=jnp.float32)
    out2 = jax.block_until_ready(se_layer(x2, w1, w2))
    ref2 = se_layer_ref(x2, w1, w2)
    assert jnp.allclose(out2, ref2, atol=1e-5, rtol=1e-5), "mismatch (padded HW)"

    print("KERNEL_OK")
</pallas_src>

<mosaic_0001>
module attributes {stable_mosaic.version = 11 : i64} {
  func.func @se_kernel(%arg0: i32, %arg1: memref<1x16x256xf32, #tpu.memory_space<vmem>>, %arg2: memref<16x2xf32, #tpu.memory_space<vmem>>, %arg3: memref<2x16xf32, #tpu.memory_space<vmem>>, %arg4: memref<1x16x256xf32, #tpu.memory_space<vmem>>) attributes {dimension_semantics = [#tpu.dimension_semantics<parallel>], iteration_bounds = array<i64: 2>, scalar_prefetch = 0 : i64, scratch_operands = 0 : i64, tpu.core_type = #tpu.core_type<tc>, window_params = [{transform_indices = @transform_0, window_bounds = array<i64: 1, 16, 256>}, {pipeline_mode = #tpu.pipeline_mode<synchronous>, transform_indices = @transform_1, window_bounds = array<i64: 16, 2>}, {pipeline_mode = #tpu.pipeline_mode<synchronous>, transform_indices = @transform_2, window_bounds = array<i64: 2, 16>}, {transform_indices = @transform_3, window_bounds = array<i64: 1, 16, 256>}]} {
    %c0 = arith.constant 0 : index
    %c0_0 = arith.constant 0 : index
    %c0_1 = arith.constant 0 : index
    %0 = vector.load %arg1[%c0, %c0_0, %c0_1] : memref<1x16x256xf32, #tpu.memory_space<vmem>>, vector<1x16x256xf32>
    %cst = arith.constant dense<0.000000e+00> : vector<1x16xf32>
    %1 = vector.multi_reduction <add>, %0, %cst [2] : vector<1x16x256xf32> to vector<1x16xf32>
    %cst_2 = arith.constant 3.906250e-03 : f32
    %2 = vector.broadcast %cst_2 : f32 to vector<1x16xf32>
    %3 = arith.mulf %1, %2 : vector<1x16xf32>
    %c0_3 = arith.constant 0 : index
    %c0_4 = arith.constant 0 : index
    %4 = vector.load %arg2[%c0_3, %c0_4] : memref<16x2xf32, #tpu.memory_space<vmem>>, vector<16x2xf32>
    %cst_5 = arith.constant dense<0.000000e+00> : vector<1x2xf32>
    %5 = tpu.matmul %3, %4, %cst_5 {dimension_numbers = #tpu.dot_dimension_numbers<[1], [0], [0], [1], [0, 0, 1, 1], [], []>} : vector<1x16xf32>, vector<16x2xf32>, vector<1x2xf32> -> vector<1x2xf32>
    %cst_6 = arith.constant 0.000000e+00 : f32
    %6 = vector.broadcast %cst_6 : f32 to vector<1x2xf32>
    %7 = arith.maximumf %5, %6 : vector<1x2xf32>
    %c0_7 = arith.constant 0 : index
    %c0_8 = arith.constant 0 : index
    %8 = vector.load %arg3[%c0_7, %c0_8] : memref<2x16xf32, #tpu.memory_space<vmem>>, vector<2x16xf32>
    %cst_9 = arith.constant dense<0.000000e+00> : vector<1x16xf32>
    %9 = tpu.matmul %7, %8, %cst_9 {dimension_numbers = #tpu.dot_dimension_numbers<[1], [0], [0], [1], [0, 0, 1, 1], [], []>} : vector<1x2xf32>, vector<2x16xf32>, vector<1x16xf32> -> vector<1x16xf32>
    %10 = arith.negf %9 : vector<1x16xf32>
    %11 = math.exp %10 : vector<1x16xf32>
    %cst_10 = arith.constant 1.000000e+00 : f32
    %12 = vector.broadcast %cst_10 : f32 to vector<1x16xf32>
    %13 = arith.addf %12, %11 : vector<1x16xf32>
    %14 = arith.divf %12, %13 : vector<1x16xf32>
    %c0_11 = arith.constant 0 : index
    %c0_12 = arith.constant 0 : index
    %c0_13 = arith.constant 0 : index
    %15 = vector.load %arg1[%c0_11, %c0_12, %c0_13] : memref<1x16x256xf32, #tpu.memory_space<vmem>>, vector<1x16x256xf32>
    %16 = vector.shape_cast %14 : vector<1x16xf32> to vector<1x16x1xf32>
    %17 = vector.broadcast %16 : vector<1x16x1xf32> to vector<1x16x256xf32>
    %18 = arith.mulf %15, %17 : vector<1x16x256xf32>
    %c0_14 = arith.constant 0 : index
    %c0_15 = arith.constant 0 : index
    %c0_16 = arith.constant 0 : index
    %19 = vector.load %arg4[%c0_14, %c0_15, %c0_16] : memref<1x16x256xf32, #tpu.memory_space<vmem>>, vector<1x16x256xf32>
    tpu.vector_store %arg4[%c0_14, %c0_15, %c0_16], %18 {strides = array<i32>} : memref<1x16x256xf32, #tpu.memory_space<vmem>>, vector<1x16x256xf32>,
    return
  }
  func.func @transform_0(%arg0: i32) -> (i32, i32, i32) {
    %c0_i32 = arith.constant 0 : i32
    %c0_i32_0 = arith.constant 0 : i32
    %c0_i32_1 = arith.constant 0 : i32
    return %arg0, %c0_i32, %c0_i32_0 : i32, i32, i32
  }
  func.func @transform_1(%arg0: i32) -> (i32, i32) {
    %c0_i32 = arith.constant 0 : i32
    %c0_i32_0 = arith.constant 0 : i32
    %c0_i32_1 = arith.constant 0 : i32
    return %c0_i32, %c0_i32_0 : i32, i32
  }
  func.func @transform_2(%arg0: i32) -> (i32, i32) {
    %c0_i32 = arith.constant 0 : i32
    %c0_i32_0 = arith.constant 0 : i32
    %c0_i32_1 = arith.constant 0 : i32
    return %c0_i32, %c0_i32_0 : i32, i32
  }
  func.func @transform_3(%arg0: i32) -> (i32, i32, i32) {
    %c0_i32 = arith.constant 0 : i32
    %c0_i32_0 = arith.constant 0 : i32
    %c0_i32_1 = arith.constant 0 : i32
    return %arg0, %c0_i32, %c0_i32_0 : i32, i32, i32
  }
}

</mosaic_0001>

<bundles_post_ra>
// kernel: tpu_custom_call.1
= control target key start
LH: loop header
LB: loop body
LE: loop exit
PB: predicated region body
PF: predicated region fallthrough
CT: control target
= control target key end

     0   :  { %8 = vsyncpa [#allocation3], 0  ;;  %s873_s0 = inlined_call_operand.hbm [shape: f32[2,16,256], index: 0, kind: input, shape index: {}]   ;;  %s874_s1 = inlined_call_operand.vmem [shape: f32[16,2], index: 1, kind: input, shape index: {}]   ;;  %s875_s2 = inlined_call_operand.vmem [shape: f32[2,16], index: 2, kind: input, shape index: {}]   ;;  %s876_s3 = inlined_call_operand.hbm [shape: f32[2,16,256], index: 3, kind: output, shape index: {}]  }
   0x1   :  { %10 = vsyncpa [#allocation3 + $0x1], 0 }
   0x2   :  { %11 = vsyncpa [#allocation4], 0 }
   0x3   :  { %13 = vsyncpa [#allocation4 + $0x1], 0  ;;  %s698_s12 = smov 0   ;;  %s700_s13 = smov 0  }
   0x4   :  { %s702_s14 = smov 0   ;;  %s704_s15 = smov 0  }
   0x5 LB: > { %s719_s16 = sadd.s32 4294967295, %s668_s15   ;;  %s483_s17 = sadd.s32 4294967294, %s668_s15   ;;  %s668_s15 = sphi %s704_s15, %s891_s15   ;;  %s664_s14 = sphi %s702_s14, %s890_s14   ;;  %s660_s13 = sphi %s700_s13, %s889_s13   ;;  %s656_s12 = sphi %s698_s12, %s888_s12  }
   0x6   : > { %s723_s18 = sadd.s32 1, %s668_s15   ;;  %s26_s19 = sadd.s32 1, %s664_s14 }
   0x7   : > { %s23_s20 = ssub.s32 %s668_s15, %s723_s18  ;;  %p33_p0 = scmp.ne.s32.totalorder %s664_s14, %s660_s13 }
   0x8   : > { %p24_p1 = scmp.eq.s32.totalorder %s23_s20, 0  ;;  %p34_p2 = scmp.eq.s32.totalorder %s668_s15, 0 }
   0x9   : > { %p39_p3 = scmp.ne.s32.totalorder %s660_s13, %s656_s12  ;;  %p40_p4 = scmp.eq.s32.totalorder %s719_s16, 0 }
   0xa   : > { %s735_s21 = scalar_select %p24_p1, %s664_s14, %s26_s19  }
   0xb   : > { %p737_p5 = por %p34_p2, %p33_p0  ;;  %p741_p6 = por %p40_p4, %p39_p3 }
   0xc   : > { %p105_p7 = scmp.eq.s32.totalorder %s719_s16, 1  ;;  %p111_p8 = scmp.eq.s32.totalorder %s483_s17, 1 }
   0xd   : > { %s880_s23 = scalar_select %p741_p6, 1, 0 }
   0xe   : > { %p532_p10 = scmp.lt.s32.totalorder %s668_s15, 2  ;;  %p748_p11 = por %p105_p7, %p33_p0 }
   0xf   : > { %p752_p12 = por %p111_p8, %p39_p3  ;;  %s137_s26 = sand.u32 1, %s664_s14  }
  0x10   : > { %s881_s24 = scalar_select %p748_p11, 1, 0 }
  0x11   : > { %s882_s25 = scalar_select %p752_p12, 1, 0 }
  0x12   : > { %s501_s27 = sshll.u32 %s668_s15, 9  ;;  %s486_s28 = sshll.u32 %s137_s26, 5 }
  0x13   : > { %s761_s4 = scalar_lea.hbm %s873_s0, %s501_s27  ;;  %s141_s5 = scalar_lea.vmem [#allocation2], %s486_s28 }
  0x14   : > { %s148_s6 = sshll.u32 %s141_s5, 4  ;;  %p765_p13 = pnand %p532_p10, %p737_p5  ;;  %s769_s6 = int_to_ptr.vmem [resolvable:$true] %s148_s6 }
  0x15   : > { %s771_s8 = scalar_lea.sflag [#allocation3], %s137_s26  ;;  %s576_s9 = scalar_lea.hbm %s761_s4, 512 }
  0x16   : > { %p577_p0 = scmp.ne.s32.totalorder %s761_s4, %s576_s9  ;;  %p578_p1 = pneg %p765_p13 }
  0x17   : > { %s581_s17 = scalar_lea.hbm %s873_s0, 1024  ;;  %p582_p4 = scmp.lt.s32.totalorder %s761_s4, %s873_s0 }
  0x18   : > { %p579_p2 = pnand %p578_p1, %p577_p0  ;;  %p583_p5 = scmp.lt.s32.totalorder %s581_s17, %s576_s9 }
  0x1a   : > { %p580_p3 = pneg %p579_p2  ;;  %p584_p7 = por %p583_p5, %p582_p4 }
  0x1c   : > { %p585_p8 = pnand %p584_p7, %p580_p3 }
  0x1e   : > { %588 = shalt.err (!%p585_p8)
}
  0x1f   : > { %s589_s22 = scalar_lea.vmem %s769_s6, 512  ;;  %s670_s26 = smov [#allocation2]  }
  0x20   : > { %p590_p10 = scmp.ne.s32.totalorder %s769_s6, %s589_s22  ;;  %s594_s27 = sshll.u32 %s670_s26, 4  ;;  %s595_s27 = int_to_ptr.vmem [resolvable:$false] %s594_s27 }
  0x21   : > { %s596_s28 = scalar_lea.vmem %s595_s27, 1024  ;;  %p597_p2 = scmp.lt.s32.totalorder %s769_s6, %s595_s27 }
  0x22   : > { %p592_p9 = pnand %p590_p10, %p578_p1  ;;  %p598_p12 = scmp.lt.s32.totalorder %s596_s28, %s589_s22 }
  0x24   : > { %p593_p0 = pneg %p592_p9  ;;  %p599_p11 = por %p598_p12, %p597_p2 }
  0x26   : > { %p600_p6 = pnand %p599_p11, %p593_p0 }
  0x28   : > { %603 = shalt.err (!%p600_p6)
}
  0x29   : > { %s671_s29 = smov 256   ;;  %s672_s30 = smov 16  }
  0x2a   : > { %527 = dma.hbm_to_vmem [thread:$0]  (!%p765_p13), %s761_s4, 512, %s769_s6, %s771_s8, %s671_s29, %s671_s29, %s672_s30  }
  0x2b   : > { %p489_p9 = scmp.ge.s32.totalorder %s668_s15, 1  ;;  %p156_p1 = scmp.lt.s32.totalorder %s668_s15, 3 }
  0x2d   : > { %p157_p3 = pnand %p489_p9, %p156_p1 }
  0x2e   : > { %s795_s5 = sand.u32 (!%p157_p3), 1, %s660_s13   ;;  %p884_p6 = scmp.ne.s32.totalorder (!%p157_p3), %s880_s23, 0 }
  0x2f   : > { %160 = sbr.rel (%p157_p3) target bundleno = 760 (0x2f8), region = 32  ;;  %s490_s9 = sshll.u32 (!%p157_p3), %s795_s5, 5 }
  0x30   : > { %s163_s10 = scalar_lea.sflag (!%p157_p3), [#allocation3], %s795_s5  ;;  %s166_s11 = scalar_lea.vmem (!%p157_p3), [#allocation2], %s490_s9 }
  0x34   : > { %647 = dma.done.wait (%p884_p6), %s163_s10, 512  }
  0x35   : > { %649 = vsyncadd (%p884_p6), %s163_s10, 4294966784  ;;  %v189_v0 = vld [vmem:[%s166_s11] sm:$0xff]  ;;  %v190_v1 = vld [vmem:[%s166_s11 + $0x8] sm:$0xff]  ;;  %v673_v6 = vmov 0.0   ;;  %vm674_vm0 = vmmov 0   ;;  %v205_v9 = vlaneseq  ;;  %vm216_vm1 = vcmask 130112  }
  0x36   : > { %v805_v2 = vld [vmem:[%s166_s11 + $0x10] sm:$0xff]  ;;  %v193_v3 = vadd.f32 %v190_v1, %v189_v0  ;;  %v807_v4 = vld [vmem:[%s166_s11 + $0x18] sm:$0xff]  ;;  %508 = vmatprep.subr.mxu0 %v673_v6  ;;  %v202_v7 = vld [vmem:[%s874_s1 + $0x8] sm:$0xff]  ;;  %515 = vmatprep.subr.mxu1 %v673_v6  ;;  %vm218_vm2 = vcmask 130048   ;;  %vm297_vm3 = vcmask 1041408   ;;  %vm293_vm4 = vcmask 15360  }
  0x37   : > { %v196_v5 = vadd.f32 %v807_v4, %v805_v2  ;;  %509 = vmatpush3.msra.mxu0 %v202_v7  ;;  %v201_v8 = vld [vmem:[%s874_s1] sm:$0xff]  ;;  %512 = vmatprep.mubr.msk.f32.mxu0 %vm674_vm0, %v673_v6  ;;  %v206_v10 = vand.u32 127, %v205_v9  ;;  %v208_v11 = vshrl.u32 %v205_v9, 7  ;;  %s188_s19 = scalar_lea.vmem [#allocation5], %s490_s9  ;;  %s502_s22 = sshll.u32 %s719_s16, 9 }
  0x38   : > { %194 = vadd.xlane.f32.xlu0 %v193_v3  ;;  %510 = vmatprep.subr.mxu0 %v673_v6  ;;  %v292_v22 = vld [vmem:[%s875_s2] sm:$0x3]  ;;  %s410_s20 = sshll.u32 %s188_s19, 4  ;;  %s828_s28 = scalar_lea.hbm %s876_s3, %s502_s22  ;;  %s823_s20 = int_to_ptr.vmem [resolvable:$true] %s410_s20 }
  0x39   : > { %511 = vmatpush3.msra.mxu0 %v201_v8  ;;  %517 = vmatprep.mubr.msk.f32.mxu1 %vm674_vm0, %v673_v6  ;;  %v211_v12 = vadd.s32 4294967288, %v206_v10  ;;  %v209_v14 = vsub.s32 %v206_v10, %v208_v11  ;;  %v379_v31 = vsub.s32 0, %v208_v11  ;;  %s397_s16 = scalar_lea.sflag [#allocation4], %s795_s5  ;;  %s604_s29 = scalar_lea.vmem %s823_s20, 512 }
  0x3a   : > { %516 = vmatpush3.msk.msra.mxu1 %vm297_vm3, %v292_v22  ;;  %p605_p11 = scmp.ne.s32.totalorder %s823_s20, %s604_s29  ;;  %p885_p12 = scmp.ne.s32.totalorder %s881_s24, 0 }
  0x3b   : > { %v214_v16 = vsub.s32 %v211_v12, %v208_v11  ;;  %s675_s30 = smov [#allocation5]  }
  0x3c   : > { %197 = vadd.xlane.f32.xlu0 %v196_v5  ;;  %p606_p13 = pnand %p605_p11, %p885_p12  ;;  %s608_s9 = sshll.u32 %s675_s30, 4  ;;  %s609_s9 = int_to_ptr.vmem [resolvable:$false] %s608_s9 }
  0x3d   : > { %s610_s10 = scalar_lea.vmem %s609_s9, 1024  ;;  %p611_p5 = scmp.lt.s32.totalorder %s823_s20, %s609_s9 }
  0x3e   : > { %p607_p4 = pneg %p606_p13  ;;  %p612_p7 = scmp.lt.s32.totalorder %s610_s10, %s604_s29 }
  0x40   : > { %p613_p8 = por %p612_p7, %p611_p5 }
  0x42   : > { %p614_p10 = pnand %p613_p8, %p607_p4 }
  0xc1   : > { %v195_v13 = vpop.xlane.xlu0 %194 }
  0xc2   : > { %v199_v15 = vmul.f32 0.00390625, %v195_v13 }
  0xc4   : > { %v210_v19 = vrot.slane %v199_v15, %v209_v14 }
  0xc5   : > { %v198_v17 = vpop.xlane.xlu0 %197 }
  0xc6   : > { %v200_v18 = vmul.f32 0.00390625, %v198_v17 }
  0xc8   : > { %v215_v20 = vrot.slane %v200_v18, %v214_v16 }
  0xca   : > { %v217_v21 = vsel %vm216_vm1, %v215_v20, %v210_v19 }
  0xcb   : > { %513 = vmatmul.mubr.msk.f32.vlgmr.msra.gmra.mxu0 %vm218_vm2, %v217_v21 }
 0x18b   : > { %v287_v23 = vpop.f32.mrf.mxu0 }
 0x18c   : > { %v291_v24 = vmax.f32 %v287_v23, 0.0 }
 0x18d   : > { %v514_v25 = vpop.f32.mrf.mxu0 }
 0x18e   : > { %518 = vmatmul.mubr.msk.f32.vlgmr.msra.gmra.mxu1 %vm293_vm4, %v291_v24 }
 0x24e   : > { %v367_v26 = vpop.f32.mrf.mxu1 }
 0x24f   : > { %v495_v27 = vmul.f32 -1.442695, %v367_v26 }
 0x250   : > { %v519_v28 = vpop.f32.mrf.mxu1 }
 0x251   : > { %572 = vpow2.f32 %v495_v27 }
 0x25e   : > { %v573_v29 = vpop.eup %572 }
 0x25f   : > { %v374_v30 = vadd.f32 1.0, %v573_v29 }
 0x261   : > { %574 = vrcp.f32 %v374_v30 }
 0x26e   : > { %v575_v32 = vpop.eup %574 }
 0x26f   : > { %v380_v33 = vrot.slane %v575_v32, %v379_v31 }
 0x271   : > { %382 = vbcast.lane.b32.xlu1 %v380_v33, 256 }
 0x275   : > { %386 = vbcast.lane.b32.xlu1 %v380_v33, 264 }
 0x2e3   : > { %v383_v34 = vpop.permute.xlu1 %382 }
 0x2e4   : > { %v388_v35 = vmul.f32 %v383_v34, %v189_v0  ;;  %v389_v36 = vmul.f32 %v383_v34, %v190_v1 }
 0x2e6   : > { %392 = vst [vmem:[%s188_s19] sm:$0xff] %v388_v35  ;;  %393 = vst [vmem:[%s188_s19 + $0x8] sm:$0xff] %v389_v36 }
 0x2e7   : > { %v387_v37 = vpop.permute.xlu1 %386 }
 0x2e8   : > { %v390_v38 = vmul.f32 %v387_v37, %v805_v2  ;;  %v391_v39 = vmul.f32 %v387_v37, %v807_v4 }
 0x2ea   : > { %394 = vst [vmem:[%s188_s19 + $0x10] sm:$0xff] %v390_v38  ;;  %395 = vst [vmem:[%s188_s19 + $0x18] sm:$0xff] %v391_v39 }
 0x2eb   : > { %617 = shalt.err (!%p614_p10)
}
 0x2ec   : > { %s618_s11 = scalar_lea.hbm %s828_s28, 512  ;;  %s622_s23 = scalar_lea.hbm %s876_s3, 1024 }
 0x2ed   : > { %p619_p0 = scmp.ne.s32.totalorder %s828_s28, %s618_s11  ;;  %p623_p1 = scmp.lt.s32.totalorder %s828_s28, %s876_s3 }
 0x2ee   : > { %p624_p3 = scmp.lt.s32.totalorder %s622_s23, %s618_s11 }
 0x2ef   : > { %p620_p2 = pnand %p619_p0, %p885_p12 }
 0x2f0   : > { %p625_p6 = por %p624_p3, %p623_p1 }
 0x2f1   : > { %p621_p9 = pneg %p620_p2 }
 0x2f3   : > { %p626_p11 = pnand %p625_p6, %p621_p9 }
 0x2f5   : > { %629 = shalt.err (!%p626_p11)
}
 0x2f6   : > { %s676_s17 = smov 256   ;;  %s677_s19 = smov 16  }
 0x2f7   : > { %522 = dma.vmem_to_hbm [thread:$0]  (%p885_p12), %s823_s20, 512, %s828_s28, %s397_s16, %s676_s17, %s676_s17, %s677_s19  }
 0x2f8 PF: > { %s425_s22 = sand.u32 1, %s656_s12   ;;  %p886_p13 = scmp.ne.s32.totalorder %s882_s25, 0 }
 0x2f9   : > { %p887_p4 = scmp.ge.s32.totalorder %s668_s15, 2  ;;  %s426_s26 = scalar_lea.sflag [#allocation4], %s425_s22 }
 0x2fb   : > { %p529_p5 = pnand %p887_p4, %p886_p13 }
 0x2fd   : > { %p530_p7 = pneg %p529_p5 }
 0x2ff   : > { %651 = dma.done.wait (%p530_p7), %s426_s26, 512  }
 0x300   : > { %653 = vsyncadd (%p530_p7), %s426_s26, 4294966784  ;;  %p16_p8 = scmp.ge.s32.totalorder %s723_s18, 4   ;;  %s888_s12 = smov %s660_s13 }
 0x301   : > { %s889_s13 = smov %s664_s14  ;;  %s890_s14 = smov %s735_s21 }
 0x302   : > { %s891_s15 = smov %s723_s18  ;;  %18 = sbr.rel (!%p16_p8) target bundleno = 5 (0x5), region = 77 }
 0x307   :  { %431 = vsyncpa [#allocation3], 1 }
 0x308   :  { %433 = vsyncpa [#allocation3 + $0x1], 1 }
 0x309   :  { %434 = vsyncpa [#allocation4], 1 }
 0x30a   :  { %436 = vsyncpa [#allocation4 + $0x1], 1 }

</bundles_post_ra>
